<compile_context>
chip_gen: v5e
topology: v5e:2x2
jax: 0.10.0
libtpu: 0.0.40
codegen_flags: <defaults>
</compile_context>

<pallas_src>
import numpy as np
import jax
import jax.numpy as jnp
from jax.experimental import pallas as pl
from jax.experimental.pallas import tpu as pltpu


def _make_bblock_kernel(Nb, Cin_pad, Cout, H, W, KH, KW):
    HW = H * W
    NbHW = Nb * HW
    ph, pw = KH // 2, KW // 2

    def kernel(x_ref, w_ref, b_ref, m_ref, o_ref):
        # x_ref: (Nb, Cin_pad, HW)      pixels on lanes, channels on sublanes
        # w_ref: (Cout, KH*KW*Cin_pad)  flattened conv weights
        # b_ref: (Cout, 1)
        # m_ref: (KH*KW, Nb*HW)         per-tap validity masks (0/1), per image
        # o_ref: (Nb, Cout, HW)         lane-dense output (free reshape to NCHW)
        w_all = w_ref[...]
        m_all = m_ref[...]

        # Lane-concat the Nb images once: (Cin_pad, Nb*HW).  HW is a multiple
        # of 128, so this is pure vreg stacking along lanes.
        x_big = jnp.concatenate([x_ref[n] for n in range(Nb)], axis=-1)

        slabs = []
        for kh in range(KH):
            dh = kh - ph
            for kw in range(KW):
                dw = kw - pw
                t = kh * KW + kw
                s = dh * W + dw                      # static lane shift
                if s == 0:
                    # center tap: no shift needed, mask is all ones
                    slabs.append(x_big)
                    continue
                # XLU lane rotation; want shifted[p] = x_big[p + s], i.e.
                # jnp.roll semantics with shift = -s (taken mod Nb*HW so it is
                # non-negative).  Every lane whose source pixel lies in the
                # conceptual zero padding — including row-wrap and cross-image
                # wrap introduced by the rotation — is zeroed by the mask.
                shifted = pltpu.roll(x_big, shift=(-s) % NbHW, axis=1)
                slabs.append(shifted * m_all[t:t + 1, :])

        # im2col operand, sublane-aligned (Cin_pad % 8 == 0):
        # (KH*KW*Cin_pad, Nb*HW)
        xall = jnp.concatenate(slabs, axis=0)

        # ONE fused GEMM per grid step on the MXU, f32 accumulation; bias is
        # added once to the whole (Cout, Nb*HW) result.
        out = jnp.dot(w_all, xall, preferred_element_type=jnp.float32)
        out = (out + b_ref[...]).astype(o_ref.dtype)

        # Lane-aligned (multiple-of-128) slices back into per-image layout.
        for n in range(Nb):
            o_ref[n] = out[:, n * HW:(n + 1) * HW]

    return kernel


def _num_tensorcores_per_chip():
    # v7x-class parts have 2 TensorCores/chip; v5e/v6e have 1.
    try:
        kind = (getattr(jax.devices()[0], "device_kind", "") or "").lower()
        return 2 if "v7" in kind else 1
    except Exception:
        return 1


def _pick_batch_block(N, Cin_pad, Cout, HW, KK, vmem_budget_bytes):
    """Largest divisor of N whose per-step footprint fits the VMEM budget."""
    def footprint(nb):
        f = 0
        f += 2 * nb * Cin_pad * HW * 4        # x block (double-buffered)
        f += 2 * nb * Cout * HW * 4           # out block (double-buffered)
        f += 2 * Cout * KK * Cin_pad * 4      # weights
        f += 2 * KK * nb * HW * 4             # masks
        f += KK * Cin_pad * nb * HW * 4       # im2col live values
        f += Cout * nb * HW * 4               # f32 GEMM result
        return f

    divisors = [d for d in range(1, N + 1) if N % d == 0]
    fitting = [d for d in divisors if footprint(d) <= vmem_budget_bytes] or [1]
    nb = max(fitting)
    # Single-TC parts: grid steps are a serial loop -> maximize Nb.
    # 2-TC parts: keep >=2 "parallel" steps once the batch is big enough.
    if _num_tensorcores_per_chip() >= 2 and N >= 4:
        two_step = [d for d in fitting if N // d >= 2]
        if two_step:
            nb = max(two_step)
    return nb


def bblock_forward(x_nchw, weight, bias):
    """BBlock forward (== nn.Conv2d(Cin, Cout, K, padding=K//2, bias=True)).

    x_nchw: (N, Cin, H, W)      -- PyTorch layout
    weight: (Cout, Cin, KH, KW) -- PyTorch Conv2d layout
    bias:   (Cout,)
    returns (N, Cout, H, W)
    """
    N, Cin, H, W = x_nchw.shape
    Cout, _, KH, KW = weight.shape
    HW = H * W
    KK = KH * KW
    ph, pw = KH // 2, KW // 2

    # Pad channels to a sublane multiple (8): each im2col tap slab becomes a
    # full sublane group, making the in-kernel sublane concat pure vreg
    # stacking; the extra zero K rows are free inside one MXU pass.
    Cin_pad = ((Cin + 7) // 8) * 8

    vmem_limit = 32 * 1024 * 1024
    Nb = _pick_batch_block(N, Cin_pad, Cout, HW, KK,
                           vmem_budget_bytes=(3 * vmem_limit) // 4)

    # NCHW consumed directly: (N, Cin, H, W) -> (N, Cin, H*W) is a free,
    # contiguous reshape (no transpose).  Only the (cheap) channel pad copies.
    x = x_nchw.reshape(N, Cin, HW)
    if Cin_pad != Cin:
        x = jnp.pad(x, ((0, 0), (0, Cin_pad - Cin), (0, 0)))

    # Weights flattened to one 2D slab matching im2col row order t*Cin_pad + c.
    wp = weight
    if Cin_pad != Cin:
        wp = jnp.pad(wp, ((0, 0), (0, Cin_pad - Cin), (0, 0), (0, 0)))
    w2 = jnp.transpose(wp, (0, 2, 3, 1)).reshape(Cout, KK * Cin_pad)
    b2 = bias.reshape(Cout, 1).astype(jnp.float32)

    # Per-tap validity masks for "same" padding (tiny host-built table), tiled
    # across the Nb images that share one lane-concatenated GEMM operand.
    masks = np.zeros((KK, HW), np.float32)
    hh = np.arange(H)[:, None]
    ww = np.arange(W)[None, :]
    for kh in range(KH):
        for kw in range(KW):
            dh, dw = kh - ph, kw - pw
            valid = ((hh + dh >= 0) & (hh + dh < H) &
                     (ww + dw >= 0) & (ww + dw < W))
            masks[kh * KW + kw] = valid.astype(np.float32).reshape(HW)
    masks = jnp.asarray(np.tile(masks, (1, Nb)), dtype=x.dtype)

    kernel = _make_bblock_kernel(Nb, Cin_pad, Cout, H, W, KH, KW)

    out_itemsize = np.dtype(x_nchw.dtype).itemsize
    flops = 2 * N * Cout * KK * Cin_pad * HW
    bytes_accessed = int(
        x.size * np.dtype(x.dtype).itemsize
        + w2.size * np.dtype(w2.dtype).itemsize
        + b2.size * 4
        + masks.size * np.dtype(masks.dtype).itemsize
        + N * Cout * HW * out_itemsize)

    out = pl.pallas_call(
        kernel,
        out_shape=jax.ShapeDtypeStruct((N, Cout, HW), x_nchw.dtype),
        grid_spec=pltpu.PrefetchScalarGridSpec(
            num_scalar_prefetch=0,
            grid=(N // Nb,),
            in_specs=[
                pl.BlockSpec((Nb, Cin_pad, HW), lambda i: (i, 0, 0)),
                pl.BlockSpec((Cout, KK * Cin_pad), lambda i: (0, 0)),
                pl.BlockSpec((Cout, 1), lambda i: (0, 0)),
                pl.BlockSpec((KK, Nb * HW), lambda i: (0, 0)),
            ],
            out_specs=pl.BlockSpec((Nb, Cout, HW), lambda i: (i, 0, 0)),
        ),
        compiler_params=pltpu.CompilerParams(
            dimension_semantics=("parallel",),
            vmem_limit_bytes=vmem_limit),
        cost_estimate=pl.CostEstimate(
            flops=flops, transcendentals=0, bytes_accessed=bytes_accessed),
    )(x, w2, b2, masks)

    # (N, Cout, H*W) -> (N, Cout, H, W): free reshape, no transpose.
    return out.reshape(N, Cout, H, W)


if __name__ == "__main__":
    key = jax.random.PRNGKey(0)
    k_x, k_w, k_b = jax.random.split(key, 3)

    # BBlock(in_channels=4, out_channels=8, kernel_size=3)
    N, Cin, H, W = 2, 4, 16, 16
    Cout, K = 8, 3

    x = jax.random.normal(k_x, (N, Cin, H, W), dtype=jnp.float32)
    # deterministic init (PyTorch-like uniform fan-in scale)
    fan_in = Cin * K * K
    bound = 1.0 / (fan_in ** 0.5)
    weight = jax.random.uniform(k_w, (Cout, Cin, K, K), jnp.float32, -bound, bound)
    bias = jax.random.uniform(k_b, (Cout,), jnp.float32, -bound, bound)

    out = bblock_forward(x, weight, bias)
    out = jax.block_until_ready(out)

    # reference: XLA conv with same semantics as nn.Conv2d(padding=K//2)
    ref = jax.lax.conv_general_dilated(
        x, weight, window_strides=(1, 1), padding=((K // 2, K // 2),) * 2,
        dimension_numbers=("NCHW", "OIHW", "NCHW"))
    ref = ref + bias.reshape(1, Cout, 1, 1)
    assert out.shape == (N, Cout, H, W)
    assert jnp.allclose(out, ref, atol=1e-4, rtol=1e-4), "mismatch vs reference conv"

    print("KERNEL_OK")
</pallas_src>

<mosaic_0001>
module attributes {stable_mosaic.version = 11 : i64} {
  func.func @kernel(%arg0: i32, %arg1: memref<2x8x256xf32, #tpu.memory_space<vmem>>, %arg2: memref<8x72xf32, #tpu.memory_space<vmem>>, %arg3: memref<8x1xf32, #tpu.memory_space<vmem>>, %arg4: memref<9x512xf32, #tpu.memory_space<vmem>>, %arg5: memref<2x8x256xf32, #tpu.memory_space<vmem>>) attributes {dimension_semantics = [#tpu.dimension_semantics<parallel>], iteration_bounds = array<i64: 1>, scalar_prefetch = 0 : i64, scratch_operands = 0 : i64, tpu.core_type = #tpu.core_type<tc>, window_params = [{transform_indices = @transform_0, window_bounds = array<i64: 2, 8, 256>}, {pipeline_mode = #tpu.pipeline_mode<synchronous>, transform_indices = @transform_1, window_bounds = array<i64: 8, 72>}, {pipeline_mode = #tpu.pipeline_mode<synchronous>, transform_indices = @transform_2, window_bounds = array<i64: 8, 1>}, {pipeline_mode = #tpu.pipeline_mode<synchronous>, transform_indices = @transform_3, window_bounds = array<i64: 9, 512>}, {transform_indices = @transform_4, window_bounds = array<i64: 2, 8, 256>}]} {
    %c0 = arith.constant 0 : index
    %c0_0 = arith.constant 0 : index
    %0 = vector.load %arg2[%c0, %c0_0] : memref<8x72xf32, #tpu.memory_space<vmem>>, vector<8x72xf32>
    %c0_1 = arith.constant 0 : index
    %c0_2 = arith.constant 0 : index
    %1 = vector.load %arg4[%c0_1, %c0_2] : memref<9x512xf32, #tpu.memory_space<vmem>>, vector<9x512xf32>
    %c0_3 = arith.constant 0 : index
    %c0_4 = arith.constant 0 : index
    %c0_5 = arith.constant 0 : index
    %2 = vector.load %arg1[%c0_3, %c0_4, %c0_5] : memref<2x8x256xf32, #tpu.memory_space<vmem>>, vector<1x8x256xf32>
    %3 = vector.shape_cast %2 : vector<1x8x256xf32> to vector<8x256xf32>
    %c1 = arith.constant 1 : index
    %c0_6 = arith.constant 0 : index
    %c0_7 = arith.constant 0 : index
    %4 = vector.load %arg1[%c1, %c0_6, %c0_7] : memref<2x8x256xf32, #tpu.memory_space<vmem>>, vector<1x8x256xf32>
    %5 = vector.shape_cast %4 : vector<1x8x256xf32> to vector<8x256xf32>
    %6 = tpu.concatenate %3, %5 in 1 : vector<8x256xf32>, vector<8x256xf32> -> vector<8x512xf32>
    %c17_i32 = arith.constant 17 : i32
    %7 = tpu.dynamic_rotate %6 by %c17_i32 dim 1 : vector<8x512xf32>, i32 -> vector<8x512xf32>
    %8 = vector.extract_strided_slice %1 {offsets = [0, 0], sizes = [1, 512], strides = [1, 1]} : vector<9x512xf32> to vector<1x512xf32>
    %9 = vector.broadcast %8 : vector<1x512xf32> to vector<8x512xf32>
    %10 = arith.mulf %7, %9 : vector<8x512xf32>
    %c16_i32 = arith.constant 16 : i32
    %11 = tpu.dynamic_rotate %6 by %c16_i32 dim 1 : vector<8x512xf32>, i32 -> vector<8x512xf32>
    %12 = vector.extract_strided_slice %1 {offsets = [1, 0], sizes = [1, 512], strides = [1, 1]} : vector<9x512xf32> to vector<1x512xf32>
    %13 = vector.broadcast %12 : vector<1x512xf32> to vector<8x512xf32>
    %14 = arith.mulf %11, %13 : vector<8x512xf32>
    %c15_i32 = arith.constant 15 : i32
    %15 = tpu.dynamic_rotate %6 by %c15_i32 dim 1 : vector<8x512xf32>, i32 -> vector<8x512xf32>
    %16 = vector.extract_strided_slice %1 {offsets = [2, 0], sizes = [1, 512], strides = [1, 1]} : vector<9x512xf32> to vector<1x512xf32>
    %17 = vector.broadcast %16 : vector<1x512xf32> to vector<8x512xf32>
    %18 = arith.mulf %15, %17 : vector<8x512xf32>
    %c1_i32 = arith.constant 1 : i32
    %19 = tpu.dynamic_rotate %6 by %c1_i32 dim 1 : vector<8x512xf32>, i32 -> vector<8x512xf32>
    %20 = vector.extract_strided_slice %1 {offsets = [3, 0], sizes = [1, 512], strides = [1, 1]} : vector<9x512xf32> to vector<1x512xf32>
    %21 = vector.broadcast %20 : vector<1x512xf32> to vector<8x512xf32>
    %22 = arith.mulf %19, %21 : vector<8x512xf32>
    %c511_i32 = arith.constant 511 : i32
    %23 = tpu.dynamic_rotate %6 by %c511_i32 dim 1 : vector<8x512xf32>, i32 -> vector<8x512xf32>
    %24 = vector.extract_strided_slice %1 {offsets = [5, 0], sizes = [1, 512], strides = [1, 1]} : vector<9x512xf32> to vector<1x512xf32>
    %25 = vector.broadcast %24 : vector<1x512xf32> to vector<8x512xf32>
    %26 = arith.mulf %23, %25 : vector<8x512xf32>
    %c497_i32 = arith.constant 497 : i32
    %27 = tpu.dynamic_rotate %6 by %c497_i32 dim 1 : vector<8x512xf32>, i32 -> vector<8x512xf32>
    %28 = vector.extract_strided_slice %1 {offsets = [6, 0], sizes = [1, 512], strides = [1, 1]} : vector<9x512xf32> to vector<1x512xf32>
    %29 = vector.broadcast %28 : vector<1x512xf32> to vector<8x512xf32>
    %30 = arith.mulf %27, %29 : vector<8x512xf32>
    %c496_i32 = arith.constant 496 : i32
    %31 = tpu.dynamic_rotate %6 by %c496_i32 dim 1 : vector<8x512xf32>, i32 -> vector<8x512xf32>
    %32 = vector.extract_strided_slice %1 {offsets = [7, 0], sizes = [1, 512], strides = [1, 1]} : vector<9x512xf32> to vector<1x512xf32>
    %33 = vector.broadcast %32 : vector<1x512xf32> to vector<8x512xf32>
    %34 = arith.mulf %31, %33 : vector<8x512xf32>
    %c495_i32 = arith.constant 495 : i32
    %35 = tpu.dynamic_rotate %6 by %c495_i32 dim 1 : vector<8x512xf32>, i32 -> vector<8x512xf32>
    %36 = vector.extract_strided_slice %1 {offsets = [8, 0], sizes = [1, 512], strides = [1, 1]} : vector<9x512xf32> to vector<1x512xf32>
    %37 = vector.broadcast %36 : vector<1x512xf32> to vector<8x512xf32>
    %38 = arith.mulf %35, %37 : vector<8x512xf32>
    %39 = tpu.concatenate %10, %14, %18, %22, %6, %26, %30, %34, %38 in 0 : vector<8x512xf32>, vector<8x512xf32>, vector<8x512xf32>, vector<8x512xf32>, vector<8x512xf32>, vector<8x512xf32>, vector<8x512xf32>, vector<8x512xf32>, vector<8x512xf32> -> vector<72x512xf32>
    %cst = arith.constant dense<0.000000e+00> : vector<8x512xf32>
    %40 = tpu.matmul %0, %39, %cst {dimension_numbers = #tpu.dot_dimension_numbers<[1], [0], [0], [1], [0, 0, 1, 1], [], []>} : vector<8x72xf32>, vector<72x512xf32>, vector<8x512xf32> -> vector<8x512xf32>
    %c0_8 = arith.constant 0 : index
    %c0_9 = arith.constant 0 : index
    %41 = vector.load %arg3[%c0_8, %c0_9] : memref<8x1xf32, #tpu.memory_space<vmem>>, vector<8x1xf32>
    %42 = vector.broadcast %41 : vector<8x1xf32> to vector<8x512xf32>
    %43 = arith.addf %40, %42 : vector<8x512xf32>
    %44 = vector.extract_strided_slice %43 {offsets = [0, 0], sizes = [8, 256], strides = [1, 1]} : vector<8x512xf32> to vector<8x256xf32>
    %c0_10 = arith.constant 0 : index
    %c0_11 = arith.constant 0 : index
    %c0_12 = arith.constant 0 : index
    %45 = vector.load %arg5[%c0_10, %c0_11, %c0_12] : memref<2x8x256xf32, #tpu.memory_space<vmem>>, vector<1x8x256xf32>
    %46 = vector.shape_cast %45 : vector<1x8x256xf32> to vector<8x256xf32>
    %47 = vector.shape_cast %44 : vector<8x256xf32> to vector<1x8x256xf32>
    tpu.vector_store %arg5[%c0_10, %c0_11, %c0_12], %47 {strides = array<i32>} : memref<2x8x256xf32, #tpu.memory_space<vmem>>, vector<1x8x256xf32>,
    %48 = vector.extract_strided_slice %43 {offsets = [0, 256], sizes = [8, 256], strides = [1, 1]} : vector<8x512xf32> to vector<8x256xf32>
    %c1_13 = arith.constant 1 : index
    %c0_14 = arith.constant 0 : index
    %c0_15 = arith.constant 0 : index
    %49 = vector.load %arg5[%c1_13, %c0_14, %c0_15] : memref<2x8x256xf32, #tpu.memory_space<vmem>>, vector<1x8x256xf32>
    %50 = vector.shape_cast %49 : vector<1x8x256xf32> to vector<8x256xf32>
    %51 = vector.shape_cast %48 : vector<8x256xf32> to vector<1x8x256xf32>
    tpu.vector_store %arg5[%c1_13, %c0_14, %c0_15], %51 {strides = array<i32>} : memref<2x8x256xf32, #tpu.memory_space<vmem>>, vector<1x8x256xf32>,
    return
  }
  func.func @transform_0(%arg0: i32) -> (i32, i32, i32) {
    %c0_i32 = arith.constant 0 : i32
    %c0_i32_0 = arith.constant 0 : i32
    %c0_i32_1 = arith.constant 0 : i32
    return %arg0, %c0_i32, %c0_i32_0 : i32, i32, i32
  }
  func.func @transform_1(%arg0: i32) -> (i32, i32) {
    %c0_i32 = arith.constant 0 : i32
    %c0_i32_0 = arith.constant 0 : i32
    %c0_i32_1 = arith.constant 0 : i32
    return %c0_i32, %c0_i32_0 : i32, i32
  }
  func.func @transform_2(%arg0: i32) -> (i32, i32) {
    %c0_i32 = arith.constant 0 : i32
    %c0_i32_0 = arith.constant 0 : i32
    %c0_i32_1 = arith.constant 0 : i32
    return %c0_i32, %c0_i32_0 : i32, i32
  }
  func.func @transform_3(%arg0: i32) -> (i32, i32) {
    %c0_i32 = arith.constant 0 : i32
    %c0_i32_0 = arith.constant 0 : i32
    %c0_i32_1 = arith.constant 0 : i32
    return %c0_i32, %c0_i32_0 : i32, i32
  }
  func.func @transform_4(%arg0: i32) -> (i32, i32, i32) {
    %c0_i32 = arith.constant 0 : i32
    %c0_i32_0 = arith.constant 0 : i32
    %c0_i32_1 = arith.constant 0 : i32
    return %arg0, %c0_i32, %c0_i32_0 : i32, i32, i32
  }
}

</mosaic_0001>

<bundles_post_ra>
// kernel: tpu_custom_call.1
= control target key start
LH: loop header
LB: loop body
LE: loop exit
PB: predicated region body
PF: predicated region fallthrough
CT: control target
= control target key end

     0   :  { %9 = vsyncpa [#allocation3], 0  ;;  %s703_s0 = inlined_call_operand.hbm [shape: f32[2,8,256], index: 0, kind: input, shape index: {}]   ;;  %s704_s1 = inlined_call_operand.vmem [shape: f32[8,72], index: 1, kind: input, shape index: {}]   ;;  %s705_s2 = inlined_call_operand.vmem [shape: f32[8,1], index: 2, kind: input, shape index: {}]   ;;  %s706_s3 = inlined_call_operand.hbm [shape: f32[9,512], index: 3, kind: input, shape index: {}]   ;;  %s707_s4 = inlined_call_operand.hbm [shape: f32[2,8,256], index: 4, kind: output, shape index: {}]  }
   0x1   :  { %10 = vsyncpa [#allocation6], 0 }
   0x2   :  { %11 = vsyncpa [#allocation4], 0  ;;  %s16_s17 = sshll.u32 %s703_s0, 4  ;;  %s452_s18 = smov [#allocation2]   ;;  %s17_s17 = int_to_ptr.hbm [resolvable:$true] %s16_s17 }
   0x3   :  { %s18_s19 = sshll.u32 %s452_s18, 4  ;;  %s33_s22 = sshll.u32 %s706_s3, 4  ;;  %s19_s19 = int_to_ptr.vmem [resolvable:$true] %s18_s19  ;;  %s34_s22 = int_to_ptr.hbm [resolvable:$true] %s33_s22 }
   0x4   :  { %s453_s23 = smov 256   ;;  %s454_s24 = smov 16  }
   0x5   :  { %24 = dma.hbm_to_vmem [thread:$0]  %s17_s17, 512, %s19_s19, [#allocation3], %s453_s23, %s453_s23, %s454_s24  }
   0x6   :  { %s455_s25 = smov [#allocation5]   ;;  %s456_s27 = smov 512  }
   0x7   :  { %s35_s26 = sshll.u32 %s455_s25, 4  ;;  %s457_s0 = smov 32   ;;  %s36_s26 = int_to_ptr.vmem [resolvable:$true] %s35_s26 }
   0x8   :  { %41 = dma.hbm_to_vmem [thread:$0]  %s34_s22, 1024, %s36_s26, [#allocation6], %s456_s27, %s456_s27, %s457_s0  }
   0x9   :  { %446 = dma.done.wait [#allocation3], 512  }
   0xa   :  { %447 = vsyncadd [#allocation3], 4294966784 }
   0xb   :  { %448 = dma.done.wait [#allocation6], 1024  }
   0xc   :  { %449 = vsyncadd [#allocation6], 4294966272  ;;  %v501_v0 = vld [vmem:[#allocation2 + $0x18] sm:$0xff]  ;;  %v503_v1 = vld [vmem:[#allocation2 + $0x10] sm:$0xff]  ;;  %s458_s3 = smov 111   ;;  %s459_s28 = smov 112   ;;  %v72_v6 = vlaneseq }
   0xd   :  { %v505_v2 = vld [vmem:[#allocation2] sm:$0xff]  ;;  %219 = vrot.lane.b32.xlu1 %v501_v0, %s458_s3  ;;  %196 = vrot.lane.b32.xlu2 %v503_v1, %s459_s28  ;;  %s460_s29 = smov 113   ;;  %s461_s30 = smov 127   ;;  %v519_v3 = vld [vmem:[#allocation2 + $0x8] sm:$0xff]  ;;  %v370_v8 = vld [vmem:[#allocation5 + $0x38] ss:$0 sm:$0xff] }
   0xe   :  { %213 = vrot.lane.b32.xlu0 %v505_v2, %s458_s3  ;;  %s462_s5 = smov 1   ;;  %s463_s6 = smov 15   ;;  %v547_v7 = vand.u32 127, %v72_v6  ;;  %v552_v14 = vld [vmem:[#allocation5 + $0x18] sm:$0xff]  ;;  %v554_v15 = vld [vmem:[#allocation5 + $0x10] sm:$0xff]  ;;  %v590_v49 = vld [vmem:[#allocation5] sm:$0xff] }
   0xf   :  { %s464_s7 = smov 17   ;;  %v208_v16 = vperm.slane %v552_v14, 7  ;;  %v371_v17 = vld [vmem:[#allocation5 + $0x30] ss:$0 sm:$0xff]  ;;  %v207_v21 = vperm.slane %v554_v15, 7  ;;  %v186_v28 = vperm.slane %v554_v15, 6 }
  0x10   :  { %vm221_vm0 = vcmp.lt.s32.totalorder %v547_v7, 111  ;;  %vm200_vm1 = vcmp.lt.s32.totalorder %v547_v7, 112  ;;  %vm179_vm2 = vcmp.lt.s32.totalorder %v547_v7, 113  ;;  %v187_v29 = vperm.slane %v552_v14, 6  ;;  %v372_v46 = vld [vmem:[#allocation5 + $0x20] ss:$0 sm:$0xff] }
  0x11   :  { %v165_v37 = vperm.slane %v554_v15, 5  ;;  %vm158_vm3 = vcmp.lt.s32.totalorder %v547_v7, 127  ;;  %v166_v38 = vperm.slane %v552_v14, 5  ;;  %v373_v47 = vld [vmem:[#allocation5 + $0x28] ss:$0 sm:$0xff]  ;;  %v205_v52 = vperm.slane %v590_v49, 7 }
  0x12   :  { %v592_v50 = vld [vmem:[#allocation5 + $0x8] sm:$0xff]  ;;  %v184_v60 = vperm.slane %v590_v49, 6  ;;  %vm137_vm4 = vcmp.lt.s32.totalorder %v547_v7, 1  ;;  %v144_v6 = vperm.slane %v554_v15, 3  ;;  %vm116_vm5 = vcmp.lt.s32.totalorder %v547_v7, 15  ;;  %s335_s14 = sshll.u32 %s707_s4, 4  ;;  %s336_s14 = int_to_ptr.hbm [resolvable:$true] %s335_s14 }
  0x13   :  { %v206_v53 = vperm.slane %v592_v50, 7  ;;  %v185_v61 = vperm.slane %v592_v50, 6  ;;  %vm95_vm6 = vcmp.lt.s32.totalorder %v547_v7, 16  ;;  %vm74_vm7 = vcmp.lt.s32.totalorder %v547_v7, 17 }
  0x14   :  { %vm240_vm8 = vcmask 588800  }
  0x15   :  { %198 = vrot.lane.b32.xlu2 %v501_v0, %s459_s28  ;;  %192 = vrot.lane.b32.xlu1 %v505_v2, %s459_s28 }
  0x16   :  { %217 = vrot.lane.b32.xlu0 %v503_v1, %s458_s3 }
  0x1d   :  { %177 = vrot.lane.b32.xlu2 %v501_v0, %s460_s29  ;;  %175 = vrot.lane.b32.xlu1 %v503_v1, %s460_s29 }
  0x1e   :  { %171 = vrot.lane.b32.xlu0 %v505_v2, %s460_s29 }
  0x25   :  { %156 = vrot.lane.b32.xlu2 %v501_v0, %s461_s30  ;;  %154 = vrot.lane.b32.xlu1 %v503_v1, %s461_s30 }
  0x26   :  { %150 = vrot.lane.b32.xlu0 %v505_v2, %s461_s30 }
  0x2d   :  { %131 = vrot.lane.b32.xlu2 %v519_v3, %s462_s5  ;;  %194 = vrot.lane.b32.xlu1 %v519_v3, %s459_s28 }
  0x2e   :  { %215 = vrot.lane.b32.xlu0 %v519_v3, %s458_s3 }
  0x35   :  { %173 = vrot.lane.b32.xlu2 %v519_v3, %s460_s29  ;;  %135 = vrot.lane.b32.xlu1 %v501_v0, %s462_s5 }
  0x36   :  { %133 = vrot.lane.b32.xlu0 %v503_v1, %s462_s5 }
  0x3d   :  { %114 = vrot.lane.b32.xlu2 %v501_v0, %s463_s6  ;;  %112 = vrot.lane.b32.xlu1 %v503_v1, %s463_s6 }
  0x3e   :  { %110 = vrot.lane.b32.xlu0 %v519_v3, %s463_s6 }
  0x45   :  { %91 = vrot.lane.b32.xlu2 %v503_v1, %s454_s24  ;;  %89 = vrot.lane.b32.xlu1 %v519_v3, %s454_s24 }
  0x46   :  { %152 = vrot.lane.b32.xlu0 %v519_v3, %s461_s30 }
  0x4d   :  { %68 = vrot.lane.b32.xlu2 %v503_v1, %s464_s7  ;;  %66 = vrot.lane.b32.xlu1 %v519_v3, %s464_s7 }
  0x4e   :  { %93 = vrot.lane.b32.xlu0 %v501_v0, %s454_s24 }
  0x55   :  { %108 = vrot.lane.b32.xlu2 %v505_v2, %s463_s6  ;;  %129 = vrot.lane.b32.xlu1 %v505_v2, %s462_s5 }
  0x56   :  { %70 = vrot.lane.b32.xlu0 %v501_v0, %s464_s7 }
  0x5d   :  { %64 = vrot.lane.b32.xlu1 %v505_v2, %s464_s7 }
  0x5e   :  { %87 = vrot.lane.b32.xlu0 %v505_v2, %s454_s24 }
  0x67   :  { %v545_v4 = vpop.permute.xlu2 %196 }
  0x6f   :  { %v199_v5 = vpop.permute.xlu2 %198 }
  0x70   :  { %v201_v22 = vsel %vm200_vm1, %v545_v4, %v199_v5 }
  0x71   :  { %v211_v27 = vmul.f32 %v207_v21, %v201_v22 }
  0x77   :  { %v178_v9 = vpop.permute.xlu2 %177 }
  0x7f   :  { %v220_v10 = vpop.permute.xlu1 %219  ;;  %v157_v23 = vpop.permute.xlu2 %156 }
  0x80   :  { %v214_v11 = vpop.permute.xlu0 %213 }
  0x81   :  { %v225_v12 = vsel %vm221_vm0, %v220_v10, %v214_v11 }
  0x82   :  { %v233_v13 = vmul.f32 %v370_v8, %v225_v12  ;;  %v145_v8 = vperm.slane %v552_v14, 3 }
  0x84   :  { %311 = vmatpush.msra.mxu3 %v233_v13 }
  0x87   :  { %v193_v18 = vpop.permute.xlu1 %192  ;;  %v573_v36 = vpop.permute.xlu2 %131 }
  0x88   :  { %v204_v19 = vsel %vm200_vm1, %v199_v5, %v193_v18  ;;  %v218_v20 = vpop.permute.xlu0 %217 }
  0x89   :  { %v222_v24 = vsel %vm221_vm0, %v218_v20, %v220_v10  ;;  %v212_v25 = vmul.f32 %v208_v16, %v204_v19  ;;  %v123_v19 = vperm.slane %v554_v15, 2 }
  0x8a   :  { %v232_v26 = vmul.f32 %v371_v17, %v222_v24 }
  0x8b   :  { %312 = vmatpush.msra.mxu3 %v212_v25 }
  0x8c   :  { %291 = vmatpush.msra.mxu2 %v232_v26 }
  0x8e   :  { %292 = vmatpush.msra.mxu2 %v211_v27  ;;  %v102_v27 = vperm.slane %v554_v15, 1 }
  0x8f   :  { %v176_v30 = vpop.permute.xlu1 %175  ;;  %v174_v45 = vpop.permute.xlu2 %173 }
  0x90   :  { %v180_v31 = vsel %vm179_vm2, %v176_v30, %v178_v9  ;;  %v172_v32 = vpop.permute.xlu0 %171  ;;  %v181_v62 = vsel %vm179_vm2, %v174_v45, %v176_v30 }
  0x91   :  { %v183_v33 = vsel %vm179_vm2, %v178_v9, %v172_v32  ;;  %v190_v34 = vmul.f32 %v186_v28, %v180_v31  ;;  %v182_v63 = vsel %vm179_vm2, %v172_v32, %v174_v45  ;;  %v189_v5 = vmul.f32 %v185_v61, %v181_v62  ;;  %v234_v31 = vld [vmem:[%s705_s2] sm:$0xff] }
  0x92   :  { %v191_v35 = vmul.f32 %v187_v29, %v183_v33  ;;  %v163_v28 = vperm.slane %v590_v49, 5  ;;  %v164_v29 = vperm.slane %v592_v50, 5  ;;  %v103_v45 = vperm.slane %v552_v14, 1 }
  0x93   :  { %293 = vmatpush.msra.mxu2 %v190_v34  ;;  %v465_v34 = vmov 0  }
  0x94   :  { %313 = vmatpush.msra.mxu3 %v191_v35  ;;  %368 = vset.pattern.permute.xlu2 %v465_v34 }
  0x95   :  { %369 = vset.pattern.permute.xlu0 %v465_v34  ;;  %237 = vperm.xlu2 %368, %v234_v31  }
  0x97   :  { %v578_v39 = vpop.permute.xlu1 %154  ;;  %v614_v9 = vpop.permute.xlu2 %114 }
  0x98   :  { %v159_v40 = vsel %vm158_vm3, %v578_v39, %v157_v23  ;;  %v583_v41 = vpop.permute.xlu0 %150 }
  0x99   :  { %v162_v42 = vsel %vm158_vm3, %v157_v23, %v583_v41  ;;  %v169_v43 = vmul.f32 %v165_v37, %v159_v40 }
  0x9a   :  { %v170_v44 = vmul.f32 %v166_v38, %v162_v42 }
  0x9b   :  { %294 = vmatpush.msra.mxu2 %v169_v43 }
  0x9c   :  { %314 = vmatpush.msra.mxu3 %v170_v44  ;;  %v81_v44 = vperm.slane %v554_v15, 0 }
  0x9d   :  { %295 = vmatpush.msra.mxu2 %v503_v1 }
  0x9e   :  { %315 = vmatpush.msra.mxu3 %v501_v0 }
  0x9f   :  { %v195_v48 = vpop.permute.xlu1 %194  ;;  %v92_v23 = vpop.permute.xlu2 %91 }
  0xa0   :  { %v216_v51 = vpop.permute.xlu0 %215  ;;  %v202_v54 = vsel %vm200_vm1, %v195_v48, %v545_v4  ;;  %v203_v55 = vsel %vm200_vm1, %v193_v18, %v195_v48  ;;  %v188_v4 = vmul.f32 %v184_v60, %v182_v63  ;;  %v124_v18 = vperm.slane %v552_v14, 2 }
  0xa1   :  { %v224_v56 = vsel %vm221_vm0, %v214_v11, %v216_v51  ;;  %v223_v57 = vsel %vm221_vm0, %v216_v51, %v218_v20  ;;  %v209_v0 = vmul.f32 %v205_v52, %v203_v55  ;;  %v210_v1 = vmul.f32 %v206_v53, %v202_v54  ;;  %v50_v51 = vld [vmem:[%s704_s1] sm:$0xff]  ;;  %s466_s1 = smov [#allocation7]  }
  0xa2   :  { %v230_v58 = vmul.f32 %v372_v46, %v224_v56  ;;  %v231_v59 = vmul.f32 %v373_v47, %v223_v57  ;;  %v143_v52 = vperm.slane %v592_v50, 3  ;;  %v82_v53 = vperm.slane %v552_v14, 0  ;;  %s333_s11 = sshll.u32 %s466_s1, 4  ;;  %s334_s11 = int_to_ptr.vmem [resolvable:$true] %s333_s11 }
  0xa3   :  { %v121_v55 = vperm.slane %v590_v49, 2  ;;  %v122_v56 = vperm.slane %v592_v50, 2 }
  0xa4   :  { %251 = vmatpush.msra.mxu0 %v230_v58  ;;  %271 = vmatpush.msra.mxu1 %v231_v59 }
  0xa6   :  { %252 = vmatpush.msra.mxu0 %v209_v0  ;;  %272 = vmatpush.msra.mxu1 %v210_v1 }
  0xa7   :  { %v616_v10 = vpop.permute.xlu1 %135  ;;  %v69_v43 = vpop.permute.xlu2 %68 }
  0xa8   :  { %v134_v11 = vpop.permute.xlu0 %133  ;;  %253 = vmatpush.msra.mxu0 %v188_v4  ;;  %273 = vmatpush.msra.mxu1 %v189_v5  ;;  %v101_v5 = vperm.slane %v592_v50, 1 }
  0xa9   :  { %v138_v12 = vsel %vm137_vm4, %v134_v11, %v616_v10  ;;  %v139_v13 = vsel %vm137_vm4, %v573_v36, %v134_v11 }
  0xaa   :  { %v148_v16 = vmul.f32 %v144_v6, %v139_v13  ;;  %v149_v17 = vmul.f32 %v145_v8, %v138_v12 }
  0xac   :  { %296 = vmatpush.msra.mxu2 %v148_v16  ;;  %316 = vmatpush.msra.mxu3 %v149_v17 }
  0xaf   :  { %v113_v20 = vpop.permute.xlu1 %112 }
  0xb0   :  { %v117_v21 = vsel %vm116_vm5, %v113_v20, %v614_v9  ;;  %v111_v22 = vpop.permute.xlu0 %110 }
  0xb1   :  { %v118_v24 = vsel %vm116_vm5, %v111_v22, %v113_v20  ;;  %v128_v25 = vmul.f32 %v124_v18, %v117_v21 }
  0xb2   :  { %v127_v26 = vmul.f32 %v123_v19, %v118_v24 }
  0xb3   :  { %317 = vmatpush.msra.mxu3 %v128_v25 }
  0xb4   :  { %297 = vmatpush.msra.mxu2 %v127_v26 }
  0xb7   :  { %v636_v30 = vpop.permute.xlu1 %89 }
  0xb8   :  { %v97_v32 = vsel %vm95_vm6, %v636_v30, %v92_v23  ;;  %v153_v33 = vpop.permute.xlu0 %152 }
  0xb9   :  { %v160_v35 = vsel %vm158_vm3, %v153_v33, %v578_v39  ;;  %v161_v37 = vsel %vm158_vm3, %v583_v41, %v153_v33  ;;  %v106_v38 = vmul.f32 %v102_v27, %v97_v32 }
  0xba   :  { %v167_v40 = vmul.f32 %v163_v28, %v161_v37  ;;  %v168_v42 = vmul.f32 %v164_v29, %v160_v35 }
  0xbb   :  { %298 = vmatpush.msra.mxu2 %v106_v38 }
  0xbc   :  { %254 = vmatpush.msra.mxu0 %v167_v40  ;;  %274 = vmatpush.msra.mxu1 %v168_v42 }
  0xbe   :  { %255 = vmatpush.msra.mxu0 %v505_v2  ;;  %275 = vmatpush.msra.mxu1 %v519_v3  ;;  %v109_v2 = vpop.permute.xlu2 %108  ;;  %v142_v3 = vperm.slane %v590_v49, 3 }
  0xbf   :  { %v67_v39 = vpop.permute.xlu1 %66  ;;  %v120_v57 = vsel %vm116_vm5, %v614_v9, %v109_v2  ;;  %v119_v58 = vsel %vm116_vm5, %v109_v2, %v111_v22  ;;  %v79_v9 = vperm.slane %v590_v49, 0 }
  0xc0   :  { %v76_v41 = vsel %vm74_vm7, %v67_v39, %v69_v43  ;;  %v94_v46 = vpop.permute.xlu0 %93  ;;  %v125_v1 = vmul.f32 %v121_v55, %v120_v57  ;;  %v126_v4 = vmul.f32 %v122_v56, %v119_v58 }
  0xc1   :  { %v96_v47 = vsel %vm95_vm6, %v92_v23, %v94_v46  ;;  %v85_v48 = vmul.f32 %v81_v44, %v76_v41 }
  0xc2   :  { %v107_v15 = vmul.f32 %v103_v45, %v96_v47 }
  0xc3   :  { %299 = vmatpush.msra.mxu2 %v85_v48 }
  0xc4   :  { %318 = vmatpush.msra.mxu3 %v107_v15  ;;  %351 = vmatmul.msk.f32.vlgmr.msra.gmra.mxu2 %vm240_vm8, %v50_v51 }
  0xc7   :  { %v130_v54 = vpop.permute.xlu1 %129 }
  0xc8   :  { %v140_v59 = vsel %vm137_vm4, %v130_v54, %v573_v36  ;;  %v141_v14 = vsel %vm137_vm4, %v616_v10, %v130_v54  ;;  %v71_v60 = vpop.permute.xlu0 %70  ;;  %v100_v36 = vperm.slane %v590_v49, 1  ;;  %v80_v10 = vperm.slane %v592_v50, 0 }
  0xc9   :  { %v75_v61 = vsel %vm74_vm7, %v69_v43, %v71_v60  ;;  %v146_v62 = vmul.f32 %v142_v3, %v141_v14  ;;  %v147_v63 = vmul.f32 %v143_v52, %v140_v59 }
  0xca   :  { %v86_v0 = vmul.f32 %v82_v53, %v75_v61 }
  0xcb   :  { %256 = vmatpush.msra.mxu0 %v146_v62  ;;  %276 = vmatpush.msra.mxu1 %v147_v63 }
  0xcc   :  { %319 = vmatpush.msra.mxu3 %v86_v0 }
  0xcd   :  { %257 = vmatpush.msra.mxu0 %v125_v1  ;;  %277 = vmatpush.msra.mxu1 %v126_v4 }
  0xce   :  { %352 = vmatmul.msk.f32.vlgmr.msra.gmra.mxu3 %vm240_vm8, %v50_v51 }
  0xcf   :  { %v65_v6 = vpop.permute.xlu1 %64 }
  0xd0   :  { %v88_v8 = vpop.permute.xlu0 %87  ;;  %v77_v11 = vsel %vm74_vm7, %v65_v6, %v67_v39  ;;  %v78_v12 = vsel %vm74_vm7, %v71_v60, %v65_v6 }
  0xd1   :  { %v98_v13 = vsel %vm95_vm6, %v88_v8, %v636_v30  ;;  %v99_v16 = vsel %vm95_vm6, %v94_v46, %v88_v8  ;;  %v83_v49 = vmul.f32 %v79_v9, %v78_v12  ;;  %v84_v19 = vmul.f32 %v80_v10, %v77_v11 }
  0xd2   :  { %v104_v17 = vmul.f32 %v100_v36, %v99_v16  ;;  %v105_v18 = vmul.f32 %v101_v5, %v98_v13 }
  0xd4   :  { %258 = vmatpush.msra.mxu0 %v104_v17  ;;  %278 = vmatpush.msra.mxu1 %v105_v18 }
  0xd6   :  { %259 = vmatpush.msra.mxu0 %v83_v49  ;;  %279 = vmatpush.msra.mxu1 %v84_v19 }
  0xd7   :  { %349 = vmatmul.msk.f32.vlgmr.msra.gmra.mxu0 %vm240_vm8, %v50_v51  ;;  %350 = vmatmul.msk.f32.vlgmr.msra.gmra.mxu1 %vm240_vm8, %v50_v51 }
  0xef   :  { %v238_v50 = vpop.permute.xlu2 %237 }
 0x147   :  { %v301_v20 = vpop.f32.mrf.mxu2 }
 0x148   :  { %v302_v21 = vadd.f32 %v301_v20, %v238_v50 }
 0x14a   :  { %327 = vst [vmem:[#allocation7 + $0x10] sm:$0xff] %v302_v21 }
 0x151   :  { %v321_v22 = vpop.f32.mrf.mxu3 }
 0x152   :  { %v322_v23 = vadd.f32 %v321_v22, %v238_v50 }
 0x154   :  { %v261_v7 = vpop.f32.mrf.mxu0  ;;  %v281_v24 = vpop.f32.mrf.mxu1  ;;  %328 = vst [vmem:[#allocation7 + $0x18] sm:$0xff] %v322_v23 }
 0x155   :  { %v262_v25 = vadd.f32 %v261_v7, %v238_v50  ;;  %v282_v26 = vadd.f32 %v281_v24, %v238_v50 }
 0x157   :  { %324 = vst [vmem:[#allocation7] sm:$0xff] %v262_v25 }
 0x158   :  { %325 = vst [vmem:[#allocation7 + $0x8] sm:$0xff] %v282_v26 }
 0x159   :  { %341 = dma.vmem_to_hbm [thread:$0]  %s334_s11, 512, %s336_s14, [#allocation4], %s453_s23, %s453_s23, %s454_s24  }
 0x15a   :  { %450 = dma.done.wait [#allocation4], 512  }
 0x15b   :  { %451 = vsyncadd [#allocation4], 4294966784 }
 0x15c   :  { %346 = vsyncpa [#allocation3], 1 }
 0x15d   :  { %347 = vsyncpa [#allocation6], 1 }
 0x15e   :  { %348 = vsyncpa [#allocation4], 1 }

</bundles_post_ra>
